<compile_context>
chip_gen: v6e
topology: v6e:2x2x1
jax: 0.10.0
libtpu: 0.0.40
codegen_flags: <defaults>
</compile_context>

<pallas_src>
import functools
import math

import jax
import jax.numpy as jnp
from jax import lax
from jax.experimental import pallas as pl
from jax.experimental.pallas import tpu as pltpu


# Finite "minus infinity": avoids exp(-inf - (-inf)) = NaN on padded rows.
NEG_INF = -1e30

# Explicit scoped-VMEM budget. Usage here is ~1 MiB, but set it explicitly with
# headroom so the same tiling is safe on v7x (64 MiB physical) as well as
# v5e/v6e (128 MiB physical).
_VMEM_LIMIT_BYTES = 32 * 1024 * 1024


def _round_up(x, m):
    return ((x + m - 1) // m) * m


# ---------------------------------------------------------------------------
# Kernel 1: fused QKV projection (scale already folded into Wq columns)
# ---------------------------------------------------------------------------
def _qkv_proj_kernel(x_ref, w_ref, qkv_ref):
    # x_ref: (tm, C)   w_ref: (C, 3*Hp)   qkv_ref: (tm, 3*Hp) laid out [q | k | v]
    qkv = jnp.dot(x_ref[...], w_ref[...], preferred_element_type=jnp.float32)
    qkv_ref[...] = qkv.astype(qkv_ref.dtype)


# ---------------------------------------------------------------------------
# Kernel 2: tiled causal attention with online softmax (flash-style)
# ---------------------------------------------------------------------------
def _flash_attn_kernel(q_ref, k_ref, v_ref, o_ref, m_sc, l_sc, acc_sc,
                       *, block_q, block_k):
    qi = pl.program_id(1)
    ki = pl.program_id(2)
    q_start = qi * block_q
    k_start = ki * block_k

    @pl.when(ki == 0)
    def _init():
        m_sc[...] = jnp.full_like(m_sc, NEG_INF)
        l_sc[...] = jnp.zeros_like(l_sc)
        acc_sc[...] = jnp.zeros_like(acc_sc)

    def accumulate(apply_mask):
        q = q_ref[...]                       # (block_q, Hp) bf16, pre-scaled
        k = k_ref[...]                       # (block_k, Hp) bf16
        v = v_ref[...]                       # (block_k, Hp) bf16
        # Contract the last dims directly — no explicit k.T, no XLU relayout.
        s = lax.dot_general(q, k, (((1,), (1,)), ((), ())),
                            preferred_element_type=jnp.float32)   # (bq, bk) f32
        if apply_mask:  # only diagonal tiles pay for the iota mask
            row = q_start + lax.broadcasted_iota(jnp.int32, s.shape, 0)
            col = k_start + lax.broadcasted_iota(jnp.int32, s.shape, 1)
            s = jnp.where(col <= row, s, NEG_INF)
        m_prev = m_sc[...]                                        # f32 stats
        m_new = jnp.maximum(m_prev, jnp.max(s, axis=-1, keepdims=True))
        alpha = jnp.exp(m_prev - m_new)
        p = jnp.exp(s - m_new)
        l_sc[...] = alpha * l_sc[...] + jnp.sum(p, axis=-1, keepdims=True)
        acc_sc[...] = alpha * acc_sc[...] + lax.dot_general(
            p.astype(v.dtype), v, (((1,), (0,)), ((), ())),
            preferred_element_type=jnp.float32)
        m_sc[...] = m_new

    # Tile entirely below the causal diagonal: no mask needed.
    @pl.when(k_start + block_k - 1 <= q_start)
    def _full_tile():
        accumulate(apply_mask=False)

    # Tile straddling the diagonal: apply the triangular mask.
    @pl.when(jnp.logical_and(k_start + block_k - 1 > q_start,
                             k_start <= q_start + block_q - 1))
    def _diag_tile():
        accumulate(apply_mask=True)

    # Tiles fully above the diagonal (k_start > q_start + block_q - 1) are
    # skipped; their K/V index_map is clamped to the diagonal so no DMA runs.

    @pl.when(ki == pl.num_programs(2) - 1)
    def _finalize():
        inv_l = pl.reciprocal(l_sc[...], approx=True)   # EUP slot, not a VPU divide
        o_ref[...] = (acc_sc[...] * inv_l).astype(o_ref.dtype)


# ---------------------------------------------------------------------------
# Wrapper
# ---------------------------------------------------------------------------
def self_attention_head(x, wk, wq, wv, *, block_q=128, block_k=128,
                        matmul_dtype=jnp.bfloat16):
    """Causal single-head self-attention. x: (B, T, C); wk/wq/wv: (C, H)."""
    B, T, C = x.shape
    H = wk.shape[1]
    out_dtype = x.dtype
    scale = 1.0 / math.sqrt(H)           # true head_dim, not the padded one

    # Lane-dense padded head dim (multiple of 128) and padded sequence length
    # so the q/k tiles divide it exactly.
    Hp = max(128, _round_up(H, 128))
    Tp = _round_up(T, max(block_q, block_k))

    x_p = x if Tp == T else jnp.pad(x, ((0, 0), (0, Tp - T), (0, 0)))

    def _pad_h(w):
        return w if Hp == H else jnp.pad(w, ((0, 0), (0, Hp - H)))

    # Fused projection weight (C, 3*Hp) laid out [Wq*scale | Wk | Wv].
    # Folding 1/sqrt(H) into Wq here (O(C*H), fuses with pad/concat/cast)
    # removes any per-tile scaling work from the kernels.
    w_qkv = jnp.concatenate([_pad_h(wq * scale), _pad_h(wk), _pad_h(wv)], axis=1)

    # bf16 matmul inputs, f32 accumulation inside the kernels.
    x_mm = x_p.astype(matmul_dtype)
    w_mm = w_qkv.astype(matmul_dtype)

    num_q = Tp // block_q
    num_k = Tp // block_k

    # ---- kernel 1: fused QKV projection -> (B, Tp, 3*Hp) -------------------
    qkv = pl.pallas_call(
        _qkv_proj_kernel,
        out_shape=jax.ShapeDtypeStruct((B, Tp, 3 * Hp), matmul_dtype),
        grid_spec=pltpu.PrefetchScalarGridSpec(
            num_scalar_prefetch=0,
            grid=(B, num_q),
            in_specs=[
                pl.BlockSpec((pl.Squeezed(), block_q, C), lambda b, i: (b, i, 0)),
                # Grid-invariant fused weight: Pallas only DMAs it once (block
                # index never changes across the grid).
                pl.BlockSpec((C, 3 * Hp), lambda b, i: (0, 0)),
            ],
            out_specs=pl.BlockSpec((pl.Squeezed(), block_q, 3 * Hp),
                                   lambda b, i: (b, i, 0)),
        ),
        compiler_params=pltpu.CompilerParams(
            dimension_semantics=("parallel", "parallel"),
            vmem_limit_bytes=_VMEM_LIMIT_BYTES),
    )(x_mm, w_mm)

    # K/V tile index: clamp to the diagonal so above-diagonal (skipped) grid
    # steps keep the previous block index and Pallas elides their DMAs.
    def _kv_index_map(slot):
        def index_map(b, qi, ki):
            kv_blocks_per_q = (block_q + block_k - 1) // block_k
            max_ki = (qi + 1) * kv_blocks_per_q - 1
            return (b, jnp.minimum(ki, max_ki), slot)
        return index_map

    # ---- kernel 2: tiled causal flash attention -> (B, Tp, Hp) -------------
    o = pl.pallas_call(
        functools.partial(_flash_attn_kernel, block_q=block_q, block_k=block_k),
        out_shape=jax.ShapeDtypeStruct((B, Tp, Hp), jnp.float32),
        grid_spec=pltpu.PrefetchScalarGridSpec(
            num_scalar_prefetch=0,
            grid=(B, num_q, num_k),
            in_specs=[
                # q, k, v are lane-aligned slices of the same fused qkv array.
                pl.BlockSpec((pl.Squeezed(), block_q, Hp),
                             lambda b, qi, ki: (b, qi, 0)),
                pl.BlockSpec((pl.Squeezed(), block_k, Hp), _kv_index_map(1)),
                pl.BlockSpec((pl.Squeezed(), block_k, Hp), _kv_index_map(2)),
            ],
            out_specs=pl.BlockSpec((pl.Squeezed(), block_q, Hp),
                                   lambda b, qi, ki: (b, qi, 0)),
            scratch_shapes=[
                pltpu.VMEM((block_q, 1), jnp.float32),    # m: running row max
                pltpu.VMEM((block_q, 1), jnp.float32),    # l: running denominator
                pltpu.VMEM((block_q, Hp), jnp.float32),   # acc: unnormalized output
            ],
        ),
        compiler_params=pltpu.CompilerParams(
            dimension_semantics=("parallel", "parallel", "arbitrary"),
            vmem_limit_bytes=_VMEM_LIMIT_BYTES),
    )(qkv, qkv, qkv)

    # TODO(synk): training-mode dropout on the attention weights would need
    # pltpu.prng_seed / pltpu.stateful_bernoulli inside kernel 2; the module is
    # evaluated with inference semantics here, so dropout is the identity.

    return o[:, :T, :H].astype(out_dtype)


# ---------------------------------------------------------------------------
# Pure-JAX reference (matches the PyTorch module's forward in eval mode)
# ---------------------------------------------------------------------------
def reference(x, wk, wq, wv):
    k = x @ wk
    q = x @ wq
    v = x @ wv
    scores = q @ jnp.swapaxes(k, -2, -1) / (k.shape[-1] ** 0.5)
    T = x.shape[1]
    mask = jnp.tril(jnp.ones((T, T)))
    scores = jnp.where(mask == 0, -jnp.inf, scores)
    p = jax.nn.softmax(scores, axis=-1)
    return p @ v


if __name__ == "__main__":
    # Shapes consistent with the module: embedding_dim=384, head_dim=64
    # (= 384 / num_heads), seq_len=256 — small, and (8,128)-friendly.
    B, T, C, H = 2, 256, 384, 64

    key = jax.random.PRNGKey(0)
    kx, kk, kq, kv = jax.random.split(key, 4)

    x = jax.random.normal(kx, (B, T, C), dtype=jnp.float32)

    # nn.Linear default init: U(-1/sqrt(fan_in), 1/sqrt(fan_in)); stored (C, H).
    bound = 1.0 / math.sqrt(C)
    wk = jax.random.uniform(kk, (C, H), jnp.float32, -bound, bound)
    wq = jax.random.uniform(kq, (C, H), jnp.float32, -bound, bound)
    wv = jax.random.uniform(kv, (C, H), jnp.float32, -bound, bound)

    out = self_attention_head(x, wk, wq, wv)
    out = jax.block_until_ready(out)

    ref = reference(x, wk, wq, wv)
    assert out.shape == (B, T, H), out.shape
    # bf16 MXU matmuls with f32 accumulation -> compare against the f32
    # reference with a bf16-appropriate tolerance.
    max_err = float(jnp.max(jnp.abs(out - ref)))
    assert max_err < 5e-2, f"max abs err {max_err}"

    print("KERNEL_OK")
</pallas_src>

<mosaic_0001>
module attributes {stable_mosaic.version = 11 : i64} {
  func.func @_qkv_proj_kernel(%arg0: i32, %arg1: i32, %arg2: memref<1x128x384xbf16, #tpu.memory_space<vmem>>, %arg3: memref<384x384xbf16, #tpu.memory_space<vmem>>, %arg4: memref<1x128x384xbf16, #tpu.memory_space<vmem>>) attributes {dimension_semantics = [#tpu.dimension_semantics<parallel>, #tpu.dimension_semantics<parallel>], iteration_bounds = array<i64: 2, 2>, scalar_prefetch = 0 : i64, scratch_operands = 0 : i64, tpu.core_type = #tpu.core_type<tc>, window_params = [{transform_indices = @transform_0, window_bounds = array<i64: 1, 128, 384>}, {pipeline_mode = #tpu.pipeline_mode<synchronous>, transform_indices = @transform_1, window_bounds = array<i64: 384, 384>}, {transform_indices = @transform_2, window_bounds = array<i64: 1, 128, 384>}]} {
    %c0 = arith.constant 0 : index
    %c0_0 = arith.constant 0 : index
    %c0_1 = arith.constant 0 : index
    %0 = vector.load %arg2[%c0, %c0_0, %c0_1] : memref<1x128x384xbf16, #tpu.memory_space<vmem>>, vector<1x128x384xbf16>
    %1 = vector.shape_cast %0 : vector<1x128x384xbf16> to vector<128x384xbf16>
    %c0_2 = arith.constant 0 : index
    %c0_3 = arith.constant 0 : index
    %2 = vector.load %arg3[%c0_2, %c0_3] : memref<384x384xbf16, #tpu.memory_space<vmem>>, vector<384x384xbf16>
    %cst = arith.constant dense<0.000000e+00> : vector<128x384xf32>
    %3 = tpu.matmul %1, %2, %cst {dimension_numbers = #tpu.dot_dimension_numbers<[1], [0], [0], [1], [0, 0, 1, 1], [], []>} : vector<128x384xbf16>, vector<384x384xbf16>, vector<128x384xf32> -> vector<128x384xf32>
    %4 = arith.truncf %3 : vector<128x384xf32> to vector<128x384xbf16>
    %c0_4 = arith.constant 0 : index
    %c0_5 = arith.constant 0 : index
    %c0_6 = arith.constant 0 : index
    %5 = vector.load %arg4[%c0_4, %c0_5, %c0_6] : memref<1x128x384xbf16, #tpu.memory_space<vmem>>, vector<1x128x384xbf16>
    %6 = vector.shape_cast %5 : vector<1x128x384xbf16> to vector<128x384xbf16>
    %7 = vector.shape_cast %4 : vector<128x384xbf16> to vector<1x128x384xbf16>
    tpu.vector_store %arg4[%c0_4, %c0_5, %c0_6], %7 {strides = array<i32>} : memref<1x128x384xbf16, #tpu.memory_space<vmem>>, vector<1x128x384xbf16>,
    return
  }
  func.func @transform_0(%arg0: i32, %arg1: i32) -> (i32, i32, i32) {
    %c0_i32 = arith.constant 0 : i32
    %c0_i32_0 = arith.constant 0 : i32
    return %arg0, %arg1, %c0_i32 : i32, i32, i32
  }
  func.func @transform_1(%arg0: i32, %arg1: i32) -> (i32, i32) {
    %c0_i32 = arith.constant 0 : i32
    %c0_i32_0 = arith.constant 0 : i32
    %c0_i32_1 = arith.constant 0 : i32
    return %c0_i32, %c0_i32_0 : i32, i32
  }
  func.func @transform_2(%arg0: i32, %arg1: i32) -> (i32, i32, i32) {
    %c0_i32 = arith.constant 0 : i32
    %c0_i32_0 = arith.constant 0 : i32
    return %arg0, %arg1, %c0_i32 : i32, i32, i32
  }
}

</mosaic_0001>

<bundles_post_ra>
// kernel: tpu_custom_call.1
= control target key start
LH: loop header
LB: loop body
LE: loop exit
PB: predicated region body
PF: predicated region fallthrough
CT: control target
= control target key end

     0   :  { %s2624_s0 = inlined_call_operand.hbm [shape: bf16[2,256,384], index: 0, kind: input, shape index: {}]   ;;  %s2625_s1 = inlined_call_operand.hbm [shape: bf16[384,384], index: 1, kind: input, shape index: {}]   ;;  %s2626_s2 = inlined_call_operand.hbm [shape: bf16[2,256,384], index: 2, kind: output, shape index: {}]  }
   0x1   :  { %2634 = sst [smem:[#allocation15_spill]] %s2625_s1 }
   0x2   :  { %7 = vsyncpa [#allocation3], 0 }
   0x3   :  { %9 = vsyncpa [#allocation3 + $0x1], 0 }
   0x4   :  { %10 = vsyncpa [#allocation6], 0 }
   0x5   :  { %11 = vsyncpa [#allocation4], 0 }
   0x6   :  { %13 = vsyncpa [#allocation4 + $0x1], 0  ;;  %s2262_s9 = smov 0   ;;  %s2264_s10 = smov 0  }
   0x7   :  { %s2266_s11 = smov 0   ;;  %s2268_s12 = smov 0  }
   0x8   :  { %s2270_s13 = smov 0   ;;  %s2272_s14 = smov 0  }
   0x9   :  { %s2274_s15 = smov 0   ;;  %s2276_s16 = smov 0  }
   0xa LB: > { %2635 = sst [smem:[#allocation11_spill]] %s2233_s15  ;;  %s1568_s17 = sadd.s32 4294967295, %s2237_s16   ;;  %s2237_s16 = sphi %s2276_s16, %s19_s16   ;;  %s2233_s15 = sphi %s2274_s15, %s2654_s15   ;;  %s2229_s14 = sphi %s2272_s14, %s2659_s14   ;;  %s2225_s13 = sphi %s2270_s13, %s2652_s13   ;;  %s2221_s12 = sphi %s2268_s12, %s2658_s12   ;;  %s2217_s11 = sphi %s2266_s11, %s2657_s11   ;;  %s2213_s10 = sphi %s2264_s10, %s2656_s10   ;;  %s2209_s9 = sphi %s2262_s9, %s2655_s9  }
   0xb   : > { %s1569_s18 = sadd.s32 4294967294, %s2237_s16   ;;  %p53_p0 = scmp.ne.s32.totalorder %s2213_s10, %s2209_s9 }
   0xc   : > { %p2306_p1 = scmp.eq.s32.totalorder %s1568_s17, 0  ;;  %p2310_p2 = scmp.eq.s32.totalorder %s1568_s17, 3 }
   0xd   : > { %p106_p3 = scmp.eq.s32.totalorder %s1569_s18, 3  ;;  %p1570_p5 = scmp.ge.s32.totalorder %s2237_s16, 1 }
   0xe   : > { %p2316_p4 = por %p2306_p1, %p53_p0  ;;  %p113_p7 = scmp.lt.s32.totalorder %s2237_s16, 5 }
   0xf   : > { %p2321_p6 = por %p106_p3, %p53_p0  ;;  %s2239_s24 = smov [#allocation5]  }
  0x10   : > { %s2638_s21 = scalar_select %p2316_p4, 1, 0 }
  0x11   : > { %s2639_s22 = scalar_select %p2321_p6, 1, 0 }
  0x12   : > { %p2326_p8 = pnand %p1570_p5, %p113_p7  ;;  %s125_s25 = sshll.u32 %s2239_s24, 4  ;;  %s126_s25 = int_to_ptr.vmem [resolvable:$true] %s125_s25 }
  0x13   : > { %2640 = sst [smem:[#allocation12_spill]] %s2639_s22  ;;  %s2094_s26 = scalar_lea.vmem %s126_s25, 9216 }
  0x14   : > { %p1869_p9 = pneg %p2326_p8  ;;  %p2095_p12 = scmp.ne.s32.totalorder %s126_s25, %s2094_s26 }
  0x15   : > { %p2102_p3 = scmp.lt.s32.totalorder %s126_s25, %s126_s25  ;;  %p2103_p6 = scmp.lt.s32.totalorder %s2094_s26, %s2094_s26 }
  0x16   : > { %p1870_p10 = pnand %p1869_p9, %p2306_p1 }
  0x17   : > { %p2104_p4 = por %p2103_p6, %p2102_p3 }
  0x18   : > { %p2085_p11 = pneg %p1870_p10 }
  0x1a   : > { %p2097_p13 = pnand %p2095_p12, %p2085_p11 }
  0x1c   : > { %p2098_p0 = pneg %p2097_p13 }
  0x1e   : > { %p2105_p5 = pnand %p2104_p4, %p2098_p0 }
  0x20   : > { %2108 = shalt.err (!%p2105_p5)
}
  0x21   : > { %s2628_s27 = smov 192   ;;  %s2629_s28 = smov 12  }
  0x22   : > { %s2642_s1 = sld [smem:[#allocation15_spill]]  ;;  %s28_s3 = sadd.s32 1, %s2229_s14 }
  0x23   : > { %p29_p4 = scmp.ge.s32.totalorder %s28_s3, 2  ;;  %s31_s4 = sadd.s32 1, %s2233_s15 }
  0x24   : > { %s40_s5 = sadd.s32 1, %s2217_s11  ;;  %p47_p6 = scmp.ne.s32.totalorder %s2217_s11, %s2213_s10 }
  0x25   : > { %s2661_s3 = smov (%p29_p4, %s28_s3), 0  ;;  %s2663_s4 = smov (!%p29_p4, %s31_s4), %s2233_s15 }
  0x26   : > { %2643 = sst [smem:[#allocation13_spill]] %s2661_s3  ;;  %s36_s6 = ssub.s32 %s2229_s14, %s2661_s3 }
  0x27   : > { %p48_p7 = scmp.eq.s32.totalorder %s2237_s16, 0  ;;  %p33_p9 = scmp.ge.s32.totalorder %s2663_s4, 2 }
  0x28   : > { %1872 = dma.hbm_to_vmem [thread:$0]  (!%p1870_p10), %s2642_s1, 9216, %s126_s25, [#allocation6], %s2628_s27, %s2628_s27, %s2629_s28  }
  0x29   : > { %p2353_p11 = por %p2310_p2, %p47_p6  ;;  %p49_p10 = por %p48_p7, %p47_p6 }
  0x2a   : > { %p1882_p12 = scmp.lt.s32.totalorder %s2237_s16, 4  ;;  %s2665_s4 = smov (%p33_p9, %s2663_s4), 0 }
  0x2b   : > { %2645 = sst [smem:[#allocation14_spill]] %s2665_s4  ;;  %s139_s8 = sand.u32 1, %s2217_s11  }
  0x2c   : > { %s1856_s17 = smul.u32 48, %s2229_s14  ;;  %s35_s18 = ssub.s32 %s2233_s15, %s2665_s4 }
  0x2d   : > { %s37_s24 = sor.u32 %s36_s6, %s35_s18  ;;  %s1855_s25 = smul.u32 192, %s139_s8 }
  0x2e   : > { %p38_p13 = scmp.eq.s32.totalorder %s37_s24, 0  ;;  %s1857_s26 = smul.u32 96, %s2233_s15 }
  0x2f   : > { %p2365_p0 = pnand %p1882_p12, %p49_p10  ;;  %s143_s27 = scalar_lea.vmem [#allocation2], %s1855_s25 }
  0x30   : > { %s2370_s20 = scalar_select %p38_p13, %s2217_s11, %s40_s5  }
  0x31   : > { %s150_s30 = sadd.s32 %s1857_s26, %s1856_s17  ;;  %s153_s28 = sshll.u32 %s143_s27, 4  ;;  %s154_s28 = int_to_ptr.vmem [resolvable:$true] %s153_s28 }
  0x32   : > { %s1575_s1 = sshll.u32 %s150_s30, 6  ;;  %s140_s6 = scalar_lea.sflag [#allocation3], %s139_s8 }
  0x33   : > { %s152_s4 = scalar_lea.hbm %s2624_s0, %s1575_s1  ;;  %p2111_p2 = pneg %p2365_p0 }
  0x34   : > { %s2122_s18 = scalar_lea.vmem %s154_s28, 3072  ;;  %s2242_s24 = smov [#allocation2]  }
  0x35   : > { %p2123_p3 = scmp.ne.s32.totalorder %s154_s28, %s2122_s18  ;;  %s2127_s15 = sshll.u32 %s2242_s24, 4  ;;  %s2128_s15 = int_to_ptr.vmem [resolvable:$false] %s2127_s15 }
  0x36   : > { %s2129_s5 = scalar_lea.vmem %s2128_s15, 6144  ;;  %p2130_p6 = scmp.lt.s32.totalorder %s154_s28, %s2128_s15 }
  0x37   : > { %p2125_p5 = pnand %p2123_p3, %p2111_p2  ;;  %p2131_p7 = scmp.lt.s32.totalorder %s2129_s5, %s2122_s18 }
  0x39   : > { %p2126_p4 = pneg %p2125_p5  ;;  %p2132_p9 = por %p2131_p7, %p2130_p6 }
  0x3b   : > { %p2133_p10 = pnand %p2132_p9, %p2126_p4 }
  0x3d   : > { %2136 = shalt.err (!%p2133_p10)
}
  0x3e   : > { %s2647_s22 = smov 12   ;;  %s2648_s1 = smov 192  }
  0x3f   : > { %1876 = dma.hbm_to_vmem [thread:$0]  (!%p2365_p0), %s152_s4, 3072, %s154_s28, %s140_s6, %s2648_s1, %s2648_s1, %s2647_s22  }
  0x40   : > { %165 = sbr.rel (%p2326_p8) target bundleno = 445 (0x1bd), region = 28  ;;  %s2385_s27 = sand.u32 (!%p2326_p8), 1, %s2213_s10  }
  0x41   : > { %s1858_s15 = smul.u32 (!%p2326_p8), 192, %s2385_s27  ;;  %s168_s3 = scalar_lea.sflag (!%p2326_p8), [#allocation3], %s2385_s27 }
  0x42   : > { %p2649_p12 = scmp.ne.s32.totalorder (!%p2326_p8), %s2638_s21, 0 }
  0x43   : > { %s2391_s8 = scalar_lea.vmem (!%p2326_p8), [#allocation2], %s1858_s15 }
  0x45   : > { %2196 = dma.done.wait (%p2649_p12), %s168_s3, 3072  }
  0x46   : > { %2198 = vsyncadd (%p2649_p12), %s168_s3, 4294964224 }
  0x47   : > { %2200 = dma.done.wait (%p2306_p1), [#allocation6], 9216  }
  0x48   : > { %2202 = vsyncadd (%p2306_p1), [#allocation6], 4294958080  ;;  %v2243_v0 = vmov 0   ;;  %v1955_v1 = vld [vmem:[#allocation5 + $0xac] ss:$12 sps:$4 sm:$0xff]   ;;  %s2475_s19 = scalar_lea.vmem [#allocation7], %s1858_s15 }
  0x49   : > { %984 = vmatprep.mubr.bf16.mxu1 %v2243_v0  ;;  %v1957_v2 = vld [vmem:[#allocation5 + $0x22c] ss:$12 sps:$4 sm:$0xff]   ;;  %839 = vmatprep.subr.bf16.mxu0 %v1955_v1  ;;  %v1959_v3 = vld [vmem:[#allocation5 + $0xa8] ss:$12 sps:$4 sm:$0xff]   ;;  %v1965_v7 = vld [vmem:[#allocation5 + $0x90] ss:$12 sps:$4 sm:$0xff]  }
  0x4a   : > { %v1960_v4 = vld [vmem:[#allocation5 + $0x228] ss:$12 sps:$4 sm:$0xff]   ;;  %952 = vmatprep.subr.bf16.mxu1 %v1957_v2  ;;  %840 = vmatpush1.bf16.msra.mxu0 %v1959_v3  ;;  %v1966_v8 = vld [vmem:[#allocation5 + $0x210] ss:$12 sps:$4 sm:$0xff]   ;;  %v1971_v11 = vld [vmem:[#allocation5 + $0x78] ss:$12 sps:$4 sm:$0xff]  }
  0x4b   : > { %v1961_v5 = vld [vmem:[#allocation5 + $0x94] ss:$12 sps:$4 sm:$0xff]   ;;  %953 = vmatpush1.bf16.msra.mxu1 %v1960_v4  ;;  %v1967_v9 = vld [vmem:[#allocation5 + $0x7c] ss:$12 sps:$4 sm:$0xff]   ;;  %v1972_v12 = vld [vmem:[#allocation5 + $0x1f8] ss:$12 sps:$4 sm:$0xff]  }
  0x4c   : > { %v1963_v6 = vld [vmem:[#allocation5 + $0x214] ss:$12 sps:$4 sm:$0xff]   ;;  %841 = vmatprep.subr.bf16.mxu0 %v1961_v5  ;;  %v1969_v10 = vld [vmem:[#allocation5 + $0x1fc] ss:$12 sps:$4 sm:$0xff]   ;;  %v1973_v13 = vld [vmem:[#allocation5 + $0x64] ss:$12 sps:$4 sm:$0xff]  }
  0x4d   : > { %954 = vmatprep.subr.bf16.mxu1 %v1963_v6  ;;  %v1975_v14 = vld [vmem:[#allocation5 + $0x1e4] ss:$12 sps:$4 sm:$0xff]   ;;  %v1977_v15 = vld [vmem:[#allocation5 + $0x60] ss:$12 sps:$4 sm:$0xff]   ;;  %v1983_v19 = vld [vmem:[#allocation5 + $0x48] ss:$12 sps:$4 sm:$0xff]  }
  0x4e   : > { %842 = vmatpush1.bf16.msra.mxu0 %v1965_v7  ;;  %v1978_v16 = vld [vmem:[#allocation5 + $0x1e0] ss:$12 sps:$4 sm:$0xff]   ;;  %v1984_v20 = vld [vmem:[#allocation5 + $0x1c8] ss:$12 sps:$4 sm:$0xff]   ;;  %v1989_v23 = vld [vmem:[#allocation5 + $0x30] ss:$12 sps:$4 sm:$0xff]  }
  0x4f   : > { %955 = vmatpush1.bf16.msra.mxu1 %v1966_v8  ;;  %843 = vmatprep.subr.bf16.mxu0 %v1967_v9  ;;  %v1979_v17 = vld [vmem:[#allocation5 + $0x4c] ss:$12 sps:$4 sm:$0xff]   ;;  %v1985_v21 = vld [vmem:[#allocation5 + $0x34] ss:$12 sps:$4 sm:$0xff]   ;;  %v1990_v24 = vld [vmem:[#allocation5 + $0x1b0] ss:$12 sps:$4 sm:$0xff]  }
  0x50   : > { %956 = vmatprep.subr.bf16.mxu1 %v1969_v10  ;;  %v1981_v18 = vld [vmem:[#allocation5 + $0x1cc] ss:$12 sps:$4 sm:$0xff]   ;;  %v1987_v22 = vld [vmem:[#allocation5 + $0x1b4] ss:$12 sps:$4 sm:$0xff]   ;;  %v1991_v25 = vld [vmem:[#allocation5 + $0x1c] ss:$12 sps:$4 sm:$0xff]  }
  0x51   : > { %v1993_v26 = vld [vmem:[#allocation5 + $0x19c] ss:$12 sps:$4 sm:$0xff]   ;;  %v1995_v27 = vld [vmem:[#allocation5 + $0x18] ss:$12 sps:$4 sm:$0xff]   ;;  %v2001_v31 = vld [vmem:[#allocation5] ss:$12 sps:$4 sm:$0xff]  }
  0x52   : > { %844 = vmatpush1.bf16.msra.mxu0 %v1971_v11  ;;  %v1996_v28 = vld [vmem:[#allocation5 + $0x198] ss:$12 sps:$4 sm:$0xff]   ;;  %v2002_v32 = vld [vmem:[#allocation5 + $0x180] ss:$12 sps:$4 sm:$0xff]   ;;  %v2006_v34 = vld [vmem:[#allocation5 + $0x170] ss:$12 sps:$4 sm:$0xff]  }
  0x53   : > { %957 = vmatpush1.bf16.msra.mxu1 %v1972_v12  ;;  %845 = vmatprep.subr.bf16.mxu0 %v1973_v13  ;;  %v1997_v29 = vld [vmem:[#allocation5 + $0x4] ss:$12 sps:$4 sm:$0xff]   ;;  %v2003_v33 = vld [vmem:[#allocation5 + $0x16c] ss:$12 sps:$4 sm:$0xff]   ;;  %v2403_v35 = vld [vmem:[%s2391_s8 + $0x8] ss:$12 sps:$4 sm:$0xff]  }
  0x54   : > { %958 = vmatprep.subr.bf16.mxu1 %v1975_v14  ;;  %v1999_v30 = vld [vmem:[#allocation5 + $0x184] ss:$12 sps:$4 sm:$0xff]   ;;  %v2007_v36 = vld [vmem:[#allocation5 + $0x168] ss:$12 sps:$4 sm:$0xff]   ;;  %v2024_v43 = vld [vmem:[#allocation5 + $0x140] ss:$12 sps:$4 sm:$0xff]  }
  0x55   : > { %v2008_v37 = vld [vmem:[#allocation5 + $0xb0] ss:$12 sps:$4 sm:$0xff]   ;;  %v2009_v38 = vld [vmem:[#allocation5 + $0x154] ss:$12 sps:$4 sm:$0xff]   ;;  %v2015_v39 = vld [vmem:[#allocation5 + $0x158] ss:$12 sps:$4 sm:$0xff]  }
  0x56   : > { %846 = vmatpush1.bf16.msra.mxu0 %v1977_v15  ;;  %v2011_v40 = vld [vmem:[#allocation5 + $0x150] ss:$12 sps:$4 sm:$0xff]   ;;  %v2017_v42 = vld [vmem:[#allocation5 + $0x98] ss:$12 sps:$4 sm:$0xff]   ;;  %v2408_v44 = vld [vmem:[%s2391_s8 + $0x20] ss:$12 sps:$4 sm:$0xff]  }
  0x57   : > { %959 = vmatpush1.bf16.msra.mxu1 %v1978_v16  ;;  %847 = vmatprep.subr.bf16.mxu0 %v1979_v17  ;;  %v2012_v41 = vld [vmem:[#allocation5 + $0x13c] ss:$12 sps:$4 sm:$0xff]   ;;  %v2016_v45 = vld [vmem:[#allocation5 + $0x138] ss:$12 sps:$4 sm:$0xff]   ;;  %v2026_v47 = vld [vmem:[#allocation5 + $0x80] ss:$12 sps:$4 sm:$0xff]  }
  0x58   : > { %960 = vmatprep.subr.bf16.mxu1 %v1981_v18  ;;  %v2018_v46 = vld [vmem:[#allocation5 + $0x124] ss:$12 sps:$4 sm:$0xff]   ;;  %v2033_v48 = vld [vmem:[#allocation5 + $0x128] ss:$12 sps:$4 sm:$0xff]   ;;  %v2020_v49 = vld [vmem:[#allocation5 + $0x120] ss:$12 sps:$4 sm:$0xff]  }
  0x59   : > { %v2021_v50 = vld [vmem:[#allocation5 + $0x10c] ss:$12 sps:$4 sm:$0xff]   ;;  %v2035_v51 = vld [vmem:[#allocation5 + $0x68] ss:$12 sps:$4 sm:$0xff]   ;;  %v2416_v53 = vld [vmem:[%s2391_s8 + $0x4] ss:$12 sps:$4 sm:$0xff]  }
  0x5a   : > { %848 = vmatpush1.bf16.msra.mxu0 %v1983_v19  ;;  %v2413_v52 = vld [vmem:[%s2391_s8 + $0x38] ss:$12 sps:$4 sm:$0xff]   ;;  %v2025_v54 = vld [vmem:[#allocation5 + $0x108] ss:$12 sps:$4 sm:$0xff]   ;;  %871 = vmatprep.mubr.bf16.mxu0 %v2416_v53  ;;  %v2043_v55 = vld [vmem:[#allocation5 + $0x110] ss:$12 sps:$4 sm:$0xff]  }
  0x5b   : > { %961 = vmatpush1.bf16.msra.mxu1 %v1984_v20  ;;  %849 = vmatprep.subr.bf16.mxu0 %v1985_v21  ;;  %v2027_v56 = vld [vmem:[#allocation5 + $0xf4] ss:$12 sps:$4 sm:$0xff]   ;;  %v2044_v57 = vld [vmem:[#allocation5 + $0x50] ss:$12 sps:$4 sm:$0xff]   ;;  %v2050_v60 = vld [vmem:[#allocation5 + $0xf8] ss:$12 sps:$4 sm:$0xff]  }
  0x5c   : > { %962 = vmatprep.subr.bf16.mxu1 %v1987_v22  ;;  %v2029_v58 = vld [vmem:[#allocation5 + $0xf0] ss:$12 sps:$4 sm:$0xff]   ;;  %v2051_v61 = vld [vmem:[#allocation5 + $0x38] ss:$12 sps:$4 sm:$0xff]   ;;  %v2057_v2 = vld [vmem:[#allocation5 + $0xe0] ss:$12 sps:$4 sm:$0xff]  }
  0x5d   : > { %v2030_v59 = vld [vmem:[#allocation5 + $0xdc] ss:$12 sps:$4 sm:$0xff]   ;;  %v2034_v63 = vld [vmem:[#allocation5 + $0xd8] ss:$12 sps:$4 sm:$0xff]   ;;  %v2058_v3 = vld [vmem:[#allocation5 + $0x20] ss:$12 sps:$4 sm:$0xff]  }
  0x5e   : > { %850 = vmatpush1.bf16.msra.mxu0 %v1989_v23  ;;  %v2422_v62 = vld [vmem:[%s2391_s8 + $0x50] ss:$12 sps:$4 sm:$0xff]   ;;  %v2038_v4 = vld [vmem:[#allocation5 + $0xc0] ss:$12 sps:$4 sm:$0xff]   ;;  %v2428_v6 = vld [vmem:[%s2391_s8 + $0x68] ss:$12 sps:$4 sm:$0xff]  }
  0x5f   : > { %963 = vmatpush1.bf16.msra.mxu1 %v1990_v24  ;;  %851 = vmatprep.subr.bf16.mxu0 %v1991_v25  ;;  %v2036_v1 = vld [vmem:[#allocation5 + $0xc4] ss:$12 sps:$4 sm:$0xff]   ;;  %v2039_v5 = vld [vmem:[%s2391_s8] ss:$12 sps:$4 sm:$0xff]   ;;  %v2046_v8 = vld [vmem:[%s2391_s8 + $0x1c] ss:$12 sps:$4 sm:$0xff]  }
  0x60   : > { %964 = vmatprep.subr.bf16.mxu1 %v1993_v26  ;;  %v2045_v7 = vld [vmem:[#allocation5 + $0x230] ss:$12 sps:$4 sm:$0xff]   ;;  %v2064_v9 = vld [vmem:[#allocation5 + $0xc8] ss:$12 sps:$4 sm:$0xff]   ;;  %v2052_v11 = vld [vmem:[#allocation5 + $0x218] ss:$12 sps:$4 sm:$0xff]  }
  0x61   : > { %v2065_v10 = vld [vmem:[#allocation5 + $0x8] ss:$12 sps:$4 sm:$0xff]   ;;  %v2059_v12 = vld [vmem:[#allocation5 + $0x200] ss:$12 sps:$4 sm:$0xff]   ;;  %v2048_v13 = vld [vmem:[%s2391_s8 + $0x18] ss:$12 sps:$4 sm:$0xff]  }
  0x62   : > { %852 = vmatpush1.bf16.msra.mxu0 %v1995_v27  ;;  %v2435_v14 = vld [vmem:[%s2391_s8 + $0x80] ss:$12 sps:$4 sm:$0xff]   ;;  %v2066_v16 = vld [vmem:[#allocation5 + $0x1e8] ss:$12 sps:$4 sm:$0xff]   ;;  %v2070_v17 = vld [vmem:[#allocation5 + $0x1d0] ss:$12 sps:$4 sm:$0xff]  }
  0x63   : > { %965 = vmatpush1.bf16.msra.mxu1 %v1996_v28  ;;  %853 = vmatprep.subr.bf16.mxu0 %v1997_v29  ;;  %v2053_v15 = vld [vmem:[%s2391_s8 + $0x34] ss:$12 sps:$4 sm:$0xff]   ;;  %v2055_v18 = vld [vmem:[%s2391_s8 + $0x30] ss:$12 sps:$4 sm:$0xff]   ;;  %v2056_v19 = vld [vmem:[%s2391_s8 + $0x98] ss:$12 sps:$4 sm:$0xff]  }
  0x64   : > { %966 = vmatprep.subr.bf16.mxu1 %v1999_v30  ;;  %v2060_v20 = vld [vmem:[%s2391_s8 + $0x4c] ss:$12 sps:$4 sm:$0xff]   ;;  %v2062_v23 = vld [vmem:[%s2391_s8 + $0x48] ss:$12 sps:$4 sm:$0xff]   ;;  %v2063_v24 = vld [vmem:[%s2391_s8 + $0xb0] ss:$12 sps:$4 sm:$0xff]  }
  0x65   : > { %v2074_v21 = vld [vmem:[#allocation5 + $0x1b8] ss:$12 sps:$4 sm:$0xff]   ;;  %v2078_v22 = vld [vmem:[#allocation5 + $0x1a0] ss:$12 sps:$4 sm:$0xff]   ;;  %v2082_v26 = vld [vmem:[#allocation5 + $0x188] ss:$12 sps:$4 sm:$0xff]  }
  0x66   : > { %854 = vmatpush1.bf16.msra.mxu0 %v2001_v31  ;;  %v2067_v25 = vld [vmem:[%s2391_s8 + $0x64] ss:$12 sps:$4 sm:$0xff]   ;;  %v2071_v27 = vld [vmem:[%s2391_s8 + $0x7c] ss:$12 sps:$4 sm:$0xff]   ;;  %v2075_v29 = vld [vmem:[%s2391_s8 + $0x94] ss:$12 sps:$4 sm:$0xff]  }
  0x67   : > { %967 = vmatpush1.bf16.msra.mxu1 %v2002_v32  ;;  %855 = vmatprep.subr.bf16.mxu0 %v2003_v33  ;;  %v2073_v28 = vld [vmem:[%s2391_s8 + $0x78] ss:$12 sps:$4 sm:$0xff]   ;;  %v2077_v30 = vld [vmem:[%s2391_s8 + $0x90] ss:$12 sps:$4 sm:$0xff]   ;;  %v2081_v32 = vld [vmem:[%s2391_s8 + $0xa8] ss:$12 sps:$4 sm:$0xff]  }
  0x68   : > { %1743 = vmatprep.subr.bf16.mxu1 %v2006_v34  ;;  %v2079_v31 = vld [vmem:[%s2391_s8 + $0xac] ss:$12 sps:$4 sm:$0xff]   ;;  %s1859_s21 = smul.u32 48, %s2221_s12  ;;  %s1452_s26 = scalar_lea.sflag [#allocation4], %s2385_s27 }
  0x69   : > { %s1860_s23 = smul.u32 96, %s2225_s13  ;;  %s1468_s13 = sshll.u32 %s2475_s19, 4  ;;  %s2569_s13 = int_to_ptr.vmem [resolvable:$true] %s1468_s13 }
  0x6a   : > { %985 = vmatmul.mubr.bf16.vlgmr.msra.gmra.mxu1 %v2403_v35  ;;  %856 = vmatpush2.bf16.msra.mxu0 %v2007_v36  ;;  %s2137_s29 = scalar_lea.vmem %s2569_s13, 3072  ;;  %s2244_s30 = smov [#allocation7]  }
  0x6b   : > { %1744 = vmatpush3.bf16.msra.mxu1 %v2008_v37  ;;  %857 = vmatprep.subr.bf16.mxu0 %v2009_v38  ;;  %s1465_s28 = sadd.s32 %s1860_s23, %s1859_s21  ;;  %p2138_p1 = scmp.ne.s32.totalorder %s2569_s13, %s2137_s29 }
  0x6c   : > { %994 = vmatprep.mubr.bf16.mxu1 %v2243_v0  ;;  %1745 = vmatprep.subr.bf16.mxu1 %v2015_v39  ;;  %s1708_s12 = sshll.u32 %s1465_s28, 6  ;;  %s2141_s6 = sshll.u32 %s2244_s30, 4  ;;  %s2142_s6 = int_to_ptr.vmem [resolvable:$false] %s2141_s6 }
  0x6d   : > { %s2567_s25 = scalar_lea.hbm %s2626_s2, %s1708_s12  ;;  %p2139_p8 = pnand %p2138_p1, %p2353_p11 }
  0x6e   : > { %858 = vmatpush2.bf16.msra.mxu0 %v2011_v40  ;;  %s2143_s18 = scalar_lea.vmem %s2142_s6, 6144  ;;  %p2144_p0 = scmp.lt.s32.totalorder %s2569_s13, %s2142_s6 }
  0x6f   : > { %1746 = vmatpush3.bf16.msra.mxu1 %v2017_v42  ;;  %859 = vmatprep.subr.bf16.mxu0 %v2012_v41  ;;  %p2140_p13 = pneg %p2139_p8  ;;  %p2145_p2 = scmp.lt.s32.totalorder %s2143_s18, %s2137_s29 }
  0x70   : > { %1747 = vmatprep.subr.bf16.mxu1 %v2024_v43 }
  0x71   : > { %p2146_p3 = por %p2145_p2, %p2144_p0 }
  0x72   : > { %995 = vmatmul.mubr.bf16.gmra.mxu1 %v2408_v44  ;;  %860 = vmatpush2.bf16.msra.mxu0 %v2016_v45 }
  0x73   : > { %1004 = vmatprep.mubr.bf16.mxu1 %v2243_v0  ;;  %861 = vmatprep.subr.bf16.mxu0 %v2018_v46  ;;  %p2147_p5 = pnand %p2146_p3, %p2140_p13 }
  0x74   : > { %1748 = vmatpush3.bf16.msra.mxu1 %v2026_v47 }
  0x75   : > { %1749 = vmatprep.subr.bf16.mxu1 %v2033_v48 }
  0x76   : > { %862 = vmatpush2.bf16.msra.mxu0 %v2020_v49 }
  0x77   : > { %863 = vmatprep.subr.bf16.mxu0 %v2021_v50 }
  0x78   : > { %1750 = vmatpush3.bf16.msra.mxu1 %v2035_v51 }
  0x79   : > { %1751 = vmatprep.subr.bf16.mxu1 %v2043_v55 }
  0x7a   : > { %1005 = vmatmul.mubr.bf16.gmra.mxu1 %v2413_v52  ;;  %864 = vmatpush2.bf16.msra.mxu0 %v2025_v54 }
  0x7b   : > { %1014 = vmatprep.mubr.bf16.mxu1 %v2243_v0  ;;  %865 = vmatprep.subr.bf16.mxu0 %v2027_v56 }
  0x7c   : > { %1752 = vmatpush3.bf16.msra.mxu1 %v2044_v57 }
  0x7d   : > { %1753 = vmatprep.subr.bf16.mxu1 %v2050_v60 }
  0x7e   : > { %866 = vmatpush2.bf16.msra.mxu0 %v2029_v58 }
  0x7f   : > { %867 = vmatprep.subr.bf16.mxu0 %v2030_v59 }
  0x80   : > { %1754 = vmatpush3.bf16.msra.mxu1 %v2051_v61 }
  0x81   : > { %1755 = vmatprep.subr.bf16.mxu1 %v2057_v2 }
  0x82   : > { %1015 = vmatmul.mubr.bf16.gmra.mxu1 %v2422_v62  ;;  %868 = vmatpush2.bf16.msra.mxu0 %v2034_v63 }
  0x83   : > { %1024 = vmatprep.mubr.bf16.mxu1 %v2243_v0  ;;  %869 = vmatprep.subr.bf16.mxu0 %v2036_v1 }
  0x84   : > { %1756 = vmatpush3.bf16.msra.mxu1 %v2058_v3 }
  0x85   : > { %1757 = vmatprep.subr.bf16.mxu1 %v2064_v9 }
  0x86   : > { %870 = vmatpush2.bf16.msra.mxu0 %v2038_v4 }
  0x87   : > { %1823 = vmatprep.subr.bf16.mxu0 %v2045_v7 }
  0x88   : > { %1758 = vmatpush3.bf16.msra.mxu1 %v2065_v10 }
  0x89   : > { %872 = vmatmul.mubr.bf16.vlgmr.msra.gmra.mxu0 %v2039_v5 }
  0x8a   : > { %1025 = vmatmul.mubr.bf16.gmra.mxu1 %v2428_v6  ;;  %1824 = vmatpush3.bf16.msra.mxu0 %v2045_v7 }
  0x8b   : > { %881 = vmatprep.mubr.bf16.mxu0 %v2046_v8  ;;  %1034 = vmatprep.mubr.bf16.mxu1 %v2243_v0 }
  0x8c   : > { %1825 = vmatprep.subr.bf16.mxu0 %v2052_v11 }
  0x8e   : > { %1826 = vmatpush3.bf16.msra.mxu0 %v2052_v11 }
  0x8f   : > { %1827 = vmatprep.subr.bf16.mxu0 %v2059_v12 }
  0x91   : > { %882 = vmatmul.mubr.bf16.gmra.mxu0 %v2048_v13 }
  0x92   : > { %1035 = vmatmul.mubr.bf16.gmra.mxu1 %v2435_v14  ;;  %891 = vmatprep.mubr.bf16.mxu0 %v2053_v15 }
  0x93   : > { %1044 = vmatprep.mubr.bf16.mxu1 %v2243_v0  ;;  %1828 = vmatpush3.bf16.msra.mxu0 %v2059_v12 }
  0x94   : > { %1829 = vmatprep.subr.bf16.mxu0 %v2066_v16 }
  0x97   : > { %1830 = vmatpush3.bf16.msra.mxu0 %v2066_v16 }
  0x98   : > { %1831 = vmatprep.subr.bf16.mxu0 %v2070_v17 }
  0x99   : > { %892 = vmatmul.mubr.bf16.gmra.mxu0 %v2055_v18 }
  0x9a   : > { %1045 = vmatmul.mubr.bf16.gmra.mxu1 %v2056_v19  ;;  %901 = vmatprep.mubr.bf16.mxu0 %v2060_v20 }
  0x9b   : > { %1054 = vmatprep.mubr.bf16.mxu1 %v2243_v0  ;;  %1832 = vmatpush3.bf16.msra.mxu0 %v2070_v17  ;;  %v2069_v0 = vld [vmem:[%s2391_s8 + $0x60] ss:$12 sps:$4 sm:$0xff]  }
  0x9c   : > { %1833 = vmatprep.subr.bf16.mxu0 %v2074_v21 }
  0x9f   : > { %1834 = vmatpush3.bf16.msra.mxu0 %v2074_v21 }
  0xa0   : > { %1835 = vmatprep.subr.bf16.mxu0 %v2078_v22 }
  0xa1   : > { %902 = vmatmul.mubr.bf16.gmra.mxu0 %v2062_v23 }
  0xa2   : > { %1055 = vmatmul.mubr.bf16.gmra.mxu1 %v2063_v24  ;;  %911 = vmatprep.mubr.bf16.mxu0 %v2067_v25 }
  0xa3   : > { %1097 = vmatprep.mubr.bf16.mxu1 %v2416_v53  ;;  %1836 = vmatpush3.bf16.msra.mxu0 %v2078_v22 }
  0xa4   : > { %1837 = vmatprep.subr.bf16.mxu0 %v2082_v26 }
  0xa7   : > { %1838 = vmatpush3.bf16.msra.mxu0 %v2082_v26 }
  0xa9   : > { %912 = vmatmul.mubr.bf16.gmra.mxu0 %v2069_v0 }
  0xaa   : > { %1098 = vmatmul.mubr.bf16.vlgmr.msra.gmra.mxu1 %v2039_v5  ;;  %921 = vmatprep.mubr.bf16.mxu0 %v2071_v27 }
  0xab   : > { %1105 = vmatprep.mubr.bf16.mxu1 %v2046_v8 }
  0xb1   : > { %922 = vmatmul.mubr.bf16.gmra.mxu0 %v2073_v28 }
  0xb2   : > { %1106 = vmatmul.mubr.bf16.gmra.mxu1 %v2048_v13  ;;  %931 = vmatprep.mubr.bf16.mxu0 %v2075_v29 }
  0xb3   : > { %1113 = vmatprep.mubr.bf16.mxu1 %v2053_v15 }
  0xb9   : > { %932 = vmatmul.mubr.bf16.gmra.mxu0 %v2077_v30 }
  0xba   : > { %1114 = vmatmul.mubr.bf16.gmra.mxu1 %v2055_v18  ;;  %941 = vmatprep.mubr.bf16.mxu0 %v2079_v31 }
  0xbb   : > { %1121 = vmatprep.mubr.bf16.mxu1 %v2060_v20 }
  0xc1   : > { %942 = vmatmul.mubr.bf16.gmra.mxu0 %v2081_v32 }
  0xc2   : > { %1122 = vmatmul.mubr.bf16.gmra.mxu1 %v2062_v23  ;;  %1839 = vmatprep.mubr.bf16.mxu0 %v2403_v35 }
  0xc3   : > { %1129 = vmatprep.mubr.bf16.mxu1 %v2067_v25 }
  0xc9   : > { %1840 = vmatmul.mubr.bf16.vlgmr.msra.gmra.mxu0 %v2408_v44 }
  0xca   : > { %1130 = vmatmul.mubr.bf16.gmra.mxu1 %v2069_v0  ;;  %1843 = vmatprep.mubr.bf16.mxu0 %v2413_v52 }
  0xcb   : > { %1137 = vmatprep.mubr.bf16.mxu1 %v2071_v27 }
  0xd1   : > { %1844 = vmatmul.mubr.bf16.gmra.mxu0 %v2422_v62 }
  0xd2   : > { %1138 = vmatmul.mubr.bf16.gmra.mxu1 %v2073_v28  ;;  %1847 = vmatprep.mubr.bf16.mxu0 %v2428_v6 }
  0xd3   : > { %1145 = vmatprep.mubr.bf16.mxu1 %v2075_v29 }
  0xd9   : > { %1848 = vmatmul.mubr.bf16.gmra.mxu0 %v2435_v14 }
  0xda   : > { %1146 = vmatmul.mubr.bf16.gmra.mxu1 %v2077_v30  ;;  %1851 = vmatprep.mubr.bf16.mxu0 %v2056_v19 }
  0xdb   : > { %1153 = vmatprep.mubr.bf16.mxu1 %v2079_v31 }
  0xe1   : > { %1852 = vmatmul.mubr.bf16.gmra.mxu0 %v2063_v24 }
  0xe2   : > { %1154 = vmatmul.mubr.bf16.gmra.mxu1 %v2081_v32 }
 0x12a   : > { %v986_v33 = vpop.f32.mrf.mxu1 }
 0x12c   : > { %v988_v34 = vpop.f32.mrf.mxu1 }
 0x12e   : > { %v990_v35 = vpop.f32.mrf.mxu1 }
 0x130   : > { %v992_v36 = vpop.f32.mrf.mxu1 }
 0x132   : > { %v996_v37 = vpop.f32.mrf.mxu1 }
 0x134   : > { %v998_v38 = vpop.f32.mrf.mxu1 }
 0x136   : > { %v1000_v39 = vpop.f32.mrf.mxu1 }
 0x138   : > { %v1002_v40 = vpop.f32.mrf.mxu1 }
 0x13a   : > { %v1006_v41 = vpop.f32.mrf.mxu1 }
 0x13c   : > { %v1008_v42 = vpop.f32.mrf.mxu1 }
 0x13e   : > { %v1010_v43 = vpop.f32.mrf.mxu1 }
 0x140   : > { %v1012_v44 = vpop.f32.mrf.mxu1 }
 0x142   : > { %v1016_v45 = vpop.f32.mrf.mxu1 }
 0x144   : > { %v1018_v46 = vpop.f32.mrf.mxu1 }
 0x146   : > { %v2461_v47 = vpop.f32.mrf.mxu1 }
 0x148   : > { %v2463_v48 = vpop.f32.mrf.mxu1 }
 0x149   : > { %v873_v49 = vpop.f32.mrf.mxu0 }
 0x14a   : > { %v2465_v50 = vpop.f32.mrf.mxu1  ;;  %v987_v53 = vadd.f32 %v986_v33, %v873_v49 }
 0x14b   : > { %v875_v51 = vpop.f32.mrf.mxu0 }
 0x14c   : > { %v2467_v52 = vpop.f32.mrf.mxu1  ;;  %v989_v54 = vadd.f32 %v988_v34, %v875_v51 }
 0x14d   : > { %v877_v55 = vpop.f32.mrf.mxu0 }
 0x14e   : > { %v2469_v56 = vpop.f32.mrf.mxu1  ;;  %v1711_v57 = vpack.c.bf16 %v989_v54, %v987_v53  ;;  %v991_v60 = vadd.f32 %v990_v35, %v877_v55 }
 0x14f   : > { %v879_v58 = vpop.f32.mrf.mxu0 }
 0x150   : > { %v2471_v59 = vpop.f32.mrf.mxu1  ;;  %1419 = vst [vmem:[%s2475_s19] sm:$0xff] %v1711_v57  ;;  %v993_v61 = vadd.f32 %v992_v36, %v879_v58 }
 0x151   : > { %v883_v62 = vpop.f32.mrf.mxu0 }
 0x152   : > { %v2478_v63 = vpop.f32.mrf.mxu1  ;;  %v1713_v1 = vpack.c.bf16 %v993_v61, %v991_v60  ;;  %v997_v4 = vadd.f32 %v996_v37, %v883_v62 }
 0x153   : > { %v885_v2 = vpop.f32.mrf.mxu0 }
 0x154   : > { %v2480_v3 = vpop.f32.mrf.mxu1  ;;  %1421 = vst [vmem:[%s2475_s19 + $0xc] sm:$0xff] %v1713_v1  ;;  %v999_v5 = vadd.f32 %v998_v38, %v885_v2 }
 0x155   : > { %v887_v6 = vpop.f32.mrf.mxu0 }
 0x156   : > { %v2483_v7 = vpop.f32.mrf.mxu1  ;;  %v1715_v8 = vpack.c.bf16 %v999_v5, %v997_v4  ;;  %v1001_v11 = vadd.f32 %v1000_v39, %v887_v6 }
 0x157   : > { %v889_v9 = vpop.f32.mrf.mxu0 }
 0x158   : > { %v2485_v10 = vpop.f32.mrf.mxu1  ;;  %1423 = vst [vmem:[%s2475_s19 + $0x18] sm:$0xff] %v1715_v8  ;;  %v1003_v12 = vadd.f32 %v1002_v40, %v889_v9 }
 0x159   : > { %v893_v13 = vpop.f32.mrf.mxu0 }
 0x15a   : > { %v2488_v14 = vpop.f32.mrf.mxu1  ;;  %v1717_v15 = vpack.c.bf16 %v1003_v12, %v1001_v11  ;;  %v1007_v18 = vadd.f32 %v1006_v41, %v893_v13 }
 0x15b   : > { %v895_v16 = vpop.f32.mrf.mxu0 }
 0x15c   : > { %v2490_v17 = vpop.f32.mrf.mxu1  ;;  %1425 = vst [vmem:[%s2475_s19 + $0x24] sm:$0xff] %v1717_v15  ;;  %v1009_v19 = vadd.f32 %v1008_v42, %v895_v16 }
 0x15d   : > { %v897_v20 = vpop.f32.mrf.mxu0 }
 0x15e   : > { %v2493_v21 = vpop.f32.mrf.mxu1  ;;  %v1719_v22 = vpack.c.bf16 %v1009_v19, %v1007_v18  ;;  %v1011_v25 = vadd.f32 %v1010_v43, %v897_v20 }
 0x15f   : > { %v899_v23 = vpop.f32.mrf.mxu0 }
 0x160   : > { %v2495_v24 = vpop.f32.mrf.mxu1  ;;  %1427 = vst [vmem:[%s2475_s19 + $0x30] sm:$0xff] %v1719_v22  ;;  %v1013_v26 = vadd.f32 %v1012_v44, %v899_v23 }
 0x161   : > { %v903_v0 = vpop.f32.mrf.mxu0 }
 0x162   : > { %v2498_v27 = vpop.f32.mrf.mxu1  ;;  %v1721_v28 = vpack.c.bf16 %v1013_v26, %v1011_v25  ;;  %v1017_v31 = vadd.f32 %v1016_v45, %v903_v0 }
 0x163   : > { %v905_v29 = vpop.f32.mrf.mxu0 }
 0x164   : > { %v2500_v30 = vpop.f32.mrf.mxu1  ;;  %1429 = vst [vmem:[%s2475_s19 + $0x3c] sm:$0xff] %v1721_v28  ;;  %v1019_v32 = vadd.f32 %v1018_v46, %v905_v29 }
 0x165   : > { %v907_v33 = vpop.f32.mrf.mxu0 }
 0x166   : > { %v2503_v34 = vpop.f32.mrf.mxu1  ;;  %v1723_v35 = vpack.c.bf16 %v1019_v32, %v1017_v31  ;;  %v1021_v38 = vadd.f32 %v2461_v47, %v907_v33 }
 0x167   : > { %v909_v36 = vpop.f32.mrf.mxu0 }
 0x168   : > { %v2505_v37 = vpop.f32.mrf.mxu1  ;;  %1431 = vst [vmem:[%s2475_s19 + $0x48] sm:$0xff] %v1723_v35  ;;  %v1023_v39 = vadd.f32 %v2463_v48, %v909_v36 }
 0x169   : > { %v913_v40 = vpop.f32.mrf.mxu0 }
 0x16a   : > { %v2510_v41 = vpop.f32.mrf.mxu1  ;;  %v1725_v42 = vpack.c.bf16 %v1023_v39, %v1021_v38  ;;  %v1027_v45 = vadd.f32 %v2465_v50, %v913_v40 }
 0x16b   : > { %v915_v43 = vpop.f32.mrf.mxu0 }
 0x16c   : > { %v2512_v44 = vpop.f32.mrf.mxu1  ;;  %1433 = vst [vmem:[%s2475_s19 + $0x54] sm:$0xff] %v1725_v42  ;;  %v1029_v46 = vadd.f32 %v2467_v52, %v915_v43 }
 0x16d   : > { %v917_v49 = vpop.f32.mrf.mxu0 }
 0x16e   : > { %v2517_v51 = vpop.f32.mrf.mxu1  ;;  %v1727_v53 = vpack.c.bf16 %v1029_v46, %v1027_v45  ;;  %v1031_v48 = vadd.f32 %v2469_v56, %v917_v49 }
 0x16f   : > { %v919_v47 = vpop.f32.mrf.mxu0 }
 0x170   : > { %v2519_v54 = vpop.f32.mrf.mxu1  ;;  %1435 = vst [vmem:[%s2475_s19 + $0x60] sm:$0xff] %v1727_v53  ;;  %v1033_v55 = vadd.f32 %v2471_v59, %v919_v47 }
 0x171   : > { %v923_v57 = vpop.f32.mrf.mxu0 }
 0x172   : > { %v1765_v58 = vpop.f32.mrf.mxu1  ;;  %v1729_v60 = vpack.c.bf16 %v1033_v55, %v1031_v48  ;;  %v1037_v52 = vadd.f32 %v2478_v63, %v923_v57 }
 0x173   : > { %v925_v61 = vpop.f32.mrf.mxu0 }
 0x174   : > { %v1766_v50 = vpop.f32.mrf.mxu1  ;;  %1437 = vst [vmem:[%s2475_s19 + $0x6c] sm:$0xff] %v1729_v60  ;;  %v1039_v62 = vadd.f32 %v2480_v3, %v925_v61 }
 0x175   : > { %v927_v1 = vpop.f32.mrf.mxu0 }
 0x176   : > { %v1768_v2 = vpop.f32.mrf.mxu1  ;;  %v1731_v4 = vpack.c.bf16 %v1039_v62, %v1037_v52  ;;  %v1041_v56 = vadd.f32 %v2483_v7, %v927_v1 }
 0x177   : > { %v929_v5 = vpop.f32.mrf.mxu0 }
 0x178   : > { %v1769_v6 = vpop.f32.mrf.mxu1  ;;  %1439 = vst [vmem:[%s2475_s19 + $0x78] sm:$0xff] %v1731_v4  ;;  %v1043_v59 = vadd.f32 %v2485_v10, %v929_v5 }
 0x179   : > { %v933_v8 = vpop.f32.mrf.mxu0  ;;  %v1770_v43 = vadd.f32 %v1769_v6, %v1768_v2 }
 0x17a   : > { %v1771_v9 = vpop.f32.mrf.mxu1  ;;  %v1733_v11 = vpack.c.bf16 %v1043_v59, %v1041_v56  ;;  %v1047_v63 = vadd.f32 %v2488_v14, %v933_v8 }
 0x17b   : > { %v935_v12 = vpop.f32.mrf.mxu0 }
 0x17c   : > { %v1772_v13 = vpop.f32.mrf.mxu1  ;;  %1441 = vst [vmem:[%s2475_s19 + $0x84] sm:$0xff] %v1733_v11  ;;  %v1049_v3 = vadd.f32 %v2490_v17, %v935_v12 }
 0x17d   : > { %v937_v15 = vpop.f32.mrf.mxu0  ;;  %v1773_v61 = vadd.f32 %v1772_v13, %v1771_v9 }
 0x17e   : > { %v1774_v16 = vpop.f32.mrf.mxu1  ;;  %v1735_v18 = vpack.c.bf16 %v1049_v3, %v1047_v63  ;;  %v1051_v7 = vadd.f32 %v2493_v21, %v937_v15  ;;  %v1767_v21 = vadd.f32 %v1766_v50, %v1765_v58 }
 0x17f   : > { %v939_v19 = vpop.f32.mrf.mxu0 }
 0x180   : > { %v1775_v20 = vpop.f32.mrf.mxu1  ;;  %1443 = vst [vmem:[%s2475_s19 + $0x90] sm:$0xff] %v1735_v18  ;;  %v1053_v10 = vadd.f32 %v2495_v24, %v939_v19 }
 0x181   : > { %v943_v22 = vpop.f32.mrf.mxu0  ;;  %v1776_v6 = vadd.f32 %v1775_v20, %v1774_v16 }
 0x182   : > { %v1777_v23 = vpop.f32.mrf.mxu1  ;;  %v1737_v25 = vpack.c.bf16 %v1053_v10, %v1051_v7  ;;  %v1057_v14 = vadd.f32 %v2498_v27, %v943_v22  ;;  %v1761_v27 = vadd.f32 %v2512_v44, %v2510_v41 }
 0x183   : > { %v945_v26 = vpop.f32.mrf.mxu0 }
 0x184   : > { %v1778_v0 = vpop.f32.mrf.mxu1  ;;  %1445 = vst [vmem:[%s2475_s19 + $0x9c] sm:$0xff] %v1737_v25  ;;  %v1059_v17 = vadd.f32 %v2500_v30, %v945_v26 }
 0x185   : > { %v947_v28 = vpop.f32.mrf.mxu0  ;;  %v1779_v48 = vadd.f32 %v1778_v0, %v1777_v23 }
 0x186   : > { %v1780_v29 = vpop.f32.mrf.mxu1  ;;  %v1739_v31 = vpack.c.bf16 %v1059_v17, %v1057_v14  ;;  %v1061_v24 = vadd.f32 %v2503_v34, %v947_v28 }
 0x187   : > { %v949_v32 = vpop.f32.mrf.mxu0 }
 0x188   : > { %v1781_v33 = vpop.f32.mrf.mxu1  ;;  %1447 = vst [vmem:[%s2475_s19 + $0xa8] sm:$0xff] %v1739_v31  ;;  %v1063_v35 = vadd.f32 %v2505_v37, %v949_v32  ;;  %v1764_v37 = vadd.f32 %v2519_v54, %v2517_v51 }
 0x189   : > { %v1841_v38 = vpop.f32.mrf.mxu0  ;;  %v1782_v54 = vadd.f32 %v1781_v33, %v1780_v29 }
 0x18a   : > { %v1783_v36 = vpop.f32.mrf.mxu1  ;;  %v1741_v39 = vpack.c.bf16 %v1063_v35, %v1061_v24  ;;  %v1205_v30 = vadd.f32 %v1841_v38, %v1767_v21 }
 0x18b   : > { %v1196_v42 = vpop.f32.mrf.mxu0 }
 0x18c   : > { %v1784_v40 = vpop.f32.mrf.mxu1  ;;  %1449 = vst [vmem:[%s2475_s19 + $0xb4] sm:$0xff] %v1741_v39  ;;  %v1716_v45 = vpack.c.bf16 %v1205_v30, %v1205_v30  ;;  %v1197_v46 = vadd.f32 %v1761_v27, %v1196_v42 }
 0x18d   : > { %v1842_v34 = vpop.f32.mrf.mxu0  ;;  %v1785_v15 = vadd.f32 %v1784_v40, %v1783_v36 }
 0x18e   : > { %v1786_v49 = vpop.f32.mrf.mxu1  ;;  %1424 = vst [vmem:[%s2475_s19 + $0x20] sm:$0xf] %v1716_v45  ;;  %v1712_v53 = vpack.c.bf16 %v1197_v46, %v1197_v46  ;;  %v1208_v47 = vadd.f32 %v1842_v34, %v1770_v43 }
 0x18f   : > { %v1199_v44 = vpop.f32.mrf.mxu0 }
 0x190   : > { %v1787_v41 = vpop.f32.mrf.mxu1  ;;  %1420 = vst [vmem:[%s2475_s19 + $0x8] sm:$0xf] %v1712_v53  ;;  %v1718_v55 = vpack.c.bf16 %v1208_v47, %v1208_v47  ;;  %v1200_v57 = vadd.f32 %v1764_v37, %v1199_v44 }
 0x191   : > { %v1845_v60 = vpop.f32.mrf.mxu0  ;;  %v1788_v26 = vadd.f32 %v1787_v41, %v1786_v49 }
 0x192   : > { %v1789_v58 = vpop.f32.mrf.mxu1  ;;  %1426 = vst [vmem:[%s2475_s19 + $0x2c] sm:$0xf] %v1718_v55  ;;  %v1714_v50 = vpack.c.bf16 %v1200_v57, %v1200_v57  ;;  %v1221_v52 = vadd.f32 %v1845_v60, %v1779_v48 }
 0x193   : > { %v1212_v51 = vpop.f32.mrf.mxu0 }
 0x194   : > { %v1790_v62 = vpop.f32.mrf.mxu1  ;;  %1422 = vst [vmem:[%s2475_s19 + $0x14] sm:$0xf] %v1714_v50  ;;  %v1724_v1 = vpack.c.bf16 %v1221_v52, %v1221_v52  ;;  %v1213_v2 = vadd.f32 %v1773_v61, %v1212_v51 }
 0x195   : > { %v1846_v5 = vpop.f32.mrf.mxu0  ;;  %v1791_v11 = vadd.f32 %v1790_v62, %v1789_v58 }
 0x196   : > { %v1792_v4 = vpop.f32.mrf.mxu1  ;;  %1432 = vst [vmem:[%s2475_s19 + $0x50] sm:$0xf] %v1724_v1  ;;  %v1720_v56 = vpack.c.bf16 %v1213_v2, %v1213_v2  ;;  %v1224_v59 = vadd.f32 %v1846_v5, %v1782_v54 }
 0x197   : > { %v1215_v9 = vpop.f32.mrf.mxu0 }
 0x198   : > { %v1793_v8 = vpop.f32.mrf.mxu1  ;;  %1428 = vst [vmem:[%s2475_s19 + $0x38] sm:$0xf] %v1720_v56  ;;  %v1726_v12 = vpack.c.bf16 %v1224_v59, %v1224_v59  ;;  %v1216_v13 = vadd.f32 %v1776_v6, %v1215_v9 }
 0x199   : > { %v1849_v3 = vpop.f32.mrf.mxu0  ;;  %v1794_v20 = vadd.f32 %v1793_v8, %v1792_v4 }
 0x19a   : > { %v1795_v63 = vpop.f32.mrf.mxu1  ;;  %1434 = vst [vmem:[%s2475_s19 + $0x5c] sm:$0xf] %v1726_v12  ;;  %v1722_v18 = vpack.c.bf16 %v1216_v13, %v1216_v13  ;;  %v1237_v19 = vadd.f32 %v1849_v3, %v1791_v11 }
 0x19b   : > { %v1228_v16 = vpop.f32.mrf.mxu0 }
 0x19c   : > { %v1796_v7 = vpop.f32.mrf.mxu1  ;;  %1430 = vst [vmem:[%s2475_s19 + $0x44] sm:$0xf] %v1722_v18  ;;  %v1732_v10 = vpack.c.bf16 %v1237_v19, %v1237_v19  ;;  %v1229_v22 = vadd.f32 %v1785_v15, %v1228_v16 }
 0x19d   : > { %v1850_v25 = vpop.f32.mrf.mxu0  ;;  %v1797_v21 = vadd.f32 %v1796_v7, %v1795_v63 }
 0x19e   : > { %v1798_v23 = vpop.f32.mrf.mxu1  ;;  %1440 = vst [vmem:[%s2475_s19 + $0x80] sm:$0xf] %v1732_v10  ;;  %v1728_v0 = vpack.c.bf16 %v1229_v22, %v1229_v22  ;;  %v1240_v14 = vadd.f32 %v1850_v25, %v1794_v20 }
 0x19f   : > { %v1231_v28 = vpop.f32.mrf.mxu0 }
 0x1a0   : > { %v1799_v17 = vpop.f32.mrf.mxu1  ;;  %1436 = vst [vmem:[%s2475_s19 + $0x68] sm:$0xf] %v1728_v0  ;;  %v1734_v29 = vpack.c.bf16 %v1240_v14, %v1240_v14  ;;  %v1232_v31 = vadd.f32 %v1788_v26, %v1231_v28 }
 0x1a1   : > { %v1853_v33 = vpop.f32.mrf.mxu0  ;;  %v1800_v40 = vadd.f32 %v1799_v17, %v1798_v23 }
 0x1a2   : > { %v1801_v32 = vpop.f32.mrf.mxu1  ;;  %1442 = vst [vmem:[%s2475_s19 + $0x8c] sm:$0xf] %v1734_v29  ;;  %v1730_v24 = vpack.c.bf16 %v1232_v31, %v1232_v31 }
 0x1a3   : > { %v1244_v36 = vpop.f32.mrf.mxu0 }
 0x1a4   : > { %v1802_v35 = vpop.f32.mrf.mxu1  ;;  %1438 = vst [vmem:[%s2475_s19 + $0x74] sm:$0xf] %v1730_v24  ;;  %v1245_v27 = vadd.f32 %v1797_v21, %v1244_v36 }
 0x1a5   : > { %v1803_v38 = vadd.f32 %v1802_v35, %v1801_v32  ;;  %v1854_v30 = vpop.f32.mrf.mxu0 }
 0x1a6   : > { %v1804_v39 = vpop.f32.mrf.mxu1  ;;  %v1736_v43 = vpack.c.bf16 %v1245_v27, %v1245_v27 }
 0x1a7   : > { %v1253_v42 = vadd.f32 %v1853_v33, %v1803_v38  ;;  %v1247_v46 = vpop.f32.mrf.mxu0 }
 0x1a8   : > { %v1805_v45 = vpop.f32.mrf.mxu1  ;;  %1444 = vst [vmem:[%s2475_s19 + $0x98] sm:$0xf] %v1736_v43  ;;  %v1248_v37 = vadd.f32 %v1800_v40, %v1247_v46 }
 0x1a9   : > { %v1740_v49 = vpack.c.bf16 %v1253_v42, %v1253_v42  ;;  %v1806_v34 = vadd.f32 %v1805_v45, %v1804_v39 }
 0x1aa   : > { %v1738_v47 = vpack.c.bf16 %v1248_v37, %v1248_v37 }
 0x1ab   : > { %1448 = vst [vmem:[%s2475_s19 + $0xb0] sm:$0xf] %v1740_v49  ;;  %v1256_v53 = vadd.f32 %v1854_v30, %v1806_v34 }
 0x1ac   : > { %1446 = vst [vmem:[%s2475_s19 + $0xa4] sm:$0xf] %v1738_v47 }
 0x1ad   : > { %v1742_v41 = vpack.c.bf16 %v1256_v53, %v1256_v53 }
 0x1af   : > { %1450 = vst [vmem:[%s2475_s19 + $0xbc] sm:$0xf] %v1742_v41 }
 0x1b0   : > { %2150 = shalt.err (!%p2147_p5)
}
 0x1b1   : > { %s2151_s24 = scalar_lea.hbm %s2567_s25, 3072  ;;  %s2155_s1 = scalar_lea.hbm %s2626_s2, 12288 }
 0x1b2   : > { %p2152_p4 = scmp.ne.s32.totalorder %s2567_s25, %s2151_s24  ;;  %p2156_p9 = scmp.lt.s32.totalorder %s2567_s25, %s2626_s2 }
 0x1b3   : > { %p2157_p10 = scmp.lt.s32.totalorder %s2155_s1, %s2151_s24 }
 0x1b4   : > { %p2153_p6 = pnand %p2152_p4, %p2353_p11 }
 0x1b5   : > { %p2158_p12 = por %p2157_p10, %p2156_p9 }
 0x1b6   : > { %p2154_p7 = pneg %p2153_p6 }
 0x1b8   : > { %p2159_p1 = pnand %p2158_p12, %p2154_p7 }
 0x1ba   : > { %2162 = shalt.err (!%p2159_p1)
}
 0x1bb   : > { %s2245_s8 = smov 192   ;;  %s2246_s19 = smov 12  }
 0x1bc   : > { %1867 = dma.vmem_to_hbm [thread:$0]  (%p2353_p11), %s2569_s13, 3072, %s2567_s25, %s1452_s26, %s2245_s8, %s2245_s8, %s2246_s19  }
 0x1bd PF: > { %s2650_s21 = sld [smem:[#allocation12_spill]]  ;;  %p1884_p8 = scmp.ge.s32.totalorder %s2237_s16, 2 }
 0x1be   : > { %s1483_s23 = sand.u32 1, %s2209_s9  }
 0x1bf   : > { %s1484_s28 = scalar_lea.sflag [#allocation4], %s1483_s23 }
 0x1c3   : > { %p2651_p13 = scmp.ne.s32.totalorder %s2650_s21, 0 }
 0x1c5   : > { %p1878_p0 = pnand %p1884_p8, %p2651_p13 }
 0x1c7   : > { %p1879_p2 = pneg %p1878_p0 }
 0x1c9   : > { %2204 = dma.done.wait (%p1879_p2), %s1484_s28, 3072  }
 0x1ca   : > { %2206 = vsyncadd (%p1879_p2), %s1484_s28, 4294964224  ;;  %s19_s16 = sadd.s32 1, %s2237_s16   ;;  %s2652_s13 = sld [smem:[#allocation11_spill]] }
 0x1cb   : > { %p16_p3 = scmp.ge.s32.totalorder %s19_s16, 6   ;;  %s2653_s7 = sld [smem:[#allocation13_spill]] }
 0x1cc   : > { %s2654_s15 = sld [smem:[#allocation14_spill]]  ;;  %s2655_s9 = smov %s2213_s10 }
 0x1cd   : > { %s2656_s10 = smov %s2217_s11  ;;  %s2657_s11 = smov %s2370_s20 }
 0x1ce   : > { %s2658_s12 = smov %s2229_s14  ;;  %18 = sbr.rel (!%p16_p3) target bundleno = 10 (0xa), region = 77 }
 0x1d1   : > { %s2659_s14 = smov %s2653_s7 }
 0x1d3   :  { %1489 = vsyncpa [#allocation3], 1 }
 0x1d4   :  { %1491 = vsyncpa [#allocation3 + $0x1], 1 }
 0x1d5   :  { %1492 = vsyncpa [#allocation6], 1 }
 0x1d6   :  { %1493 = vsyncpa [#allocation4], 1 }
 0x1d7   :  { %1495 = vsyncpa [#allocation4 + $0x1], 1 }

</bundles_post_ra>
